<compile_context>
chip_gen: v6e
topology: v6e:2x2x1
jax: 0.10.0
libtpu: 0.0.40
codegen_flags: <defaults>
</compile_context>

<pallas_src>
import jax
import jax.numpy as jnp
from jax.experimental import pallas as pl
from jax.experimental.pallas import tpu as pltpu


def _round_up(n: int, m: int) -> int:
    return ((n + m - 1) // m) * m


# ---------------------------------------------------------------------------
# Kernel
# ---------------------------------------------------------------------------
def tanh_mlp_kernel(x_ref, w1_ref, b1_ref, w2_ref, b2_ref, o_ref):
    # First linear + ReLU.  f32 accumulation on the MXU regardless of input
    # dtype (f32 or bf16); bias-add / ReLU stay in f32.
    h = jnp.dot(x_ref[...], w1_ref[...], preferred_element_type=jnp.float32)
    h = jnp.maximum(h + b1_ref[...].astype(jnp.float32), 0.0)
    # TODO(synk): dropout_rate=0.0 / eval mode -> identity.  A stochastic
    # dropout path would use pltpu.prng_seed + pltpu.prng_random_bits.
    # Second linear + tanh (tanh lowers to the EUP slot -> nearly free).
    y = jnp.dot(h.astype(w2_ref.dtype), w2_ref[...],
                preferred_element_type=jnp.float32)
    o_ref[...] = jnp.tanh(y + b2_ref[...].astype(jnp.float32)).astype(o_ref.dtype)


# ---------------------------------------------------------------------------
# One-time parameter preparation (padding / casting done ONCE, not per call)
# ---------------------------------------------------------------------------
def prepare_tanh_mlp_params(w1, b1, w2, b2, *, use_bf16: bool = False):
    """Pad/cast the constant parameters once.

    w1: (K, H)  first-layer weight, (in, out) layout
    b1: (H,)
    w2: (H, N)  second-layer weight, (in, out) layout
    b2: (N,)

    Zero padding is mathematically inert: padded K rows of W1 meet zero x
    columns, padded H columns give hidden = relu(0) = 0 which meets zero W2
    rows, and padded N columns only produce output columns that are sliced
    off by the wrapper.
    """
    K, H = w1.shape
    H2, N = w2.shape
    assert H2 == H and b1.shape == (H,) and b2.shape == (N,)

    Kp = _round_up(K, 8)      # sublane alignment for W1 only (no-op if K%8==0)
    Hp = _round_up(H, 128)    # lane-dense hidden tile (one-time pad)
    Np = _round_up(N, 128)    # lane-dense, unmasked output store

    w_dtype = jnp.bfloat16 if use_bf16 else w1.dtype
    w1_p = jnp.zeros((Kp, Hp), w_dtype).at[:K, :H].set(w1.astype(w_dtype))
    w2_p = jnp.zeros((Hp, Np), w_dtype).at[:H, :N].set(w2.astype(w_dtype))
    # Biases (and all nonlinear math) stay f32 even on the bf16 path.
    b1_p = jnp.zeros((1, Hp), jnp.float32).at[0, :H].set(b1.astype(jnp.float32))
    b2_p = jnp.zeros((1, Np), jnp.float32).at[0, :N].set(b2.astype(jnp.float32))

    return dict(w1=w1_p, b1=b1_p, w2=w2_p, b2=b2_p,
                K=K, H=H, N=N, Kp=Kp, Hp=Hp, Np=Np, use_bf16=use_bf16)


# ---------------------------------------------------------------------------
# Tiling / spec helpers
# ---------------------------------------------------------------------------
def _choose_tm(B, Kp, Np, x_itemsize, out_itemsize, resident_bytes,
               block_rows=None):
    b_rows = _round_up(B, 8)
    if block_rows is not None:
        return max(8, min(_round_up(block_rows, 8), b_rows))
    # Streamed-tile VMEM budget: 24 MiB is inside the v7x scoped default
    # (32 MiB of 64 MiB physical) and trivially safe on v5e/v6e (128 MiB).
    budget = 24 * 1024 * 1024
    per_row = 2 * (Kp * x_itemsize + Np * out_itemsize)   # double-buffered x+out
    tm_cap = max(8, ((budget - 2 * resident_bytes) // max(per_row, 1)) // 8 * 8)
    tm = min(tm_cap, b_rows)
    # For large batches keep at least 2 grid tiles so the "parallel" batch
    # axis can span both v7x TensorCores (no-op on single-TC v5e / v6e).
    if B >= 1024:
        tm = min(tm, _round_up(pl.cdiv(B, 2), 8))
    return max(8, tm)


def _resident_spec(block_shape, single_buffer):
    index_map = lambda i: (0,) * len(block_shape)
    if single_buffer:
        # Constant index_map -> the block never changes; one VMEM buffer is
        # enough (halves resident-weight footprint vs. default double-buffer).
        return pl.BlockSpec(block_shape, index_map,
                            pipeline_mode=pl.Buffered(1))
    return pl.BlockSpec(block_shape, index_map)


_SINGLE_BUFFER_OK = None  # resolved lazily (pl.Buffered(1) support probe)


# ---------------------------------------------------------------------------
# Forward pass
# ---------------------------------------------------------------------------
def tanh_mlp_apply(params, x, *, block_rows=None):
    """Fused TanhMlp forward.  x: (B, K) activations."""
    global _SINGLE_BUFFER_OK

    B, K = x.shape
    assert K == params["K"]
    Kp, Hp, Np, N = params["Kp"], params["Hp"], params["Np"], params["N"]
    out_dtype = x.dtype

    x_in = x.astype(jnp.bfloat16) if params["use_bf16"] else x
    if Kp != K:  # rare: only when K is not a multiple of 8
        x_in = jnp.pad(x_in, ((0, 0), (0, Kp - K)))

    x_itemsize = jnp.dtype(x_in.dtype).itemsize
    out_itemsize = jnp.dtype(out_dtype).itemsize
    resident_bytes = sum(int(params[k].size) * jnp.dtype(params[k].dtype).itemsize
                         for k in ("w1", "b1", "w2", "b2"))

    tm = _choose_tm(B, Kp, Np, x_itemsize, out_itemsize, resident_bytes,
                    block_rows)
    grid = (pl.cdiv(B, tm),)

    # VMEM limit derived from actual need: >=32 MiB (lifts v5e's 16 MiB scoped
    # default), <=48 MiB (safe on v7x's 64 MiB physical VMEM).
    need = 2 * resident_bytes + 2 * tm * (Kp * x_itemsize + Np * out_itemsize)
    vmem_limit = int(min(max(2 * need, 32 * 1024 * 1024), 48 * 1024 * 1024))

    cost = pl.CostEstimate(
        flops=2 * B * (params["K"] * params["H"] + params["H"] * N),
        transcendentals=B * N,  # tanh
        bytes_accessed=int(x_in.size) * x_itemsize + resident_bytes
                       + B * N * out_itemsize,
    )

    def run(single_buffer):
        in_specs = [
            # Activations: streamed, blocked over batch rows only; lane dim K
            # is unpadded (block dim == full array dim exception).
            pl.BlockSpec((tm, Kp), lambda i: (i, 0)),
            # Weights / biases: constant index_map -> resident in VMEM across
            # all batch tiles, never re-DMA'd.
            _resident_spec((Kp, Hp), single_buffer),
            _resident_spec((1, Hp), single_buffer),
            _resident_spec((Hp, Np), single_buffer),
            _resident_spec((1, Np), single_buffer),
        ]
        return pl.pallas_call(
            tanh_mlp_kernel,
            out_shape=jax.ShapeDtypeStruct((B, Np), out_dtype),
            grid=grid,
            in_specs=in_specs,
            out_specs=pl.BlockSpec((tm, Np), lambda i: (i, 0)),
            compiler_params=pltpu.CompilerParams(
                dimension_semantics=("parallel",),  # batch tiles independent
                vmem_limit_bytes=vmem_limit,
            ),
            cost_estimate=cost,
        )(x_in, params["w1"], params["b1"], params["w2"], params["b2"])

    if _SINGLE_BUFFER_OK is None:
        try:
            out_p = run(single_buffer=True)
            _SINGLE_BUFFER_OK = True
        except Exception:
            # pl.Buffered(1) on a top-level pallas_call not supported by this
            # JAX build -> fall back to default double-buffered weights.  Any
            # unrelated error re-raises identically from the fallback call.
            _SINGLE_BUFFER_OK = False
            out_p = run(single_buffer=False)
    else:
        out_p = run(single_buffer=_SINGLE_BUFFER_OK)

    return out_p[:, :N] if Np != N else out_p


def reference_tanh_mlp(x, w1, b1, w2, b2):
    h = jnp.maximum(x @ w1 + b1, 0.0)
    return jnp.tanh(h @ w2 + b2)


if __name__ == "__main__":
    # Small shapes consistent with the module: batch=8, in=32, hidden=64, out=16.
    batch, input_size, hidden_size, output_size = 8, 32, 64, 16

    key = jax.random.PRNGKey(0)
    kx, kw1, kb1, kw2, kb2 = jax.random.split(key, 5)

    x = jax.random.normal(kx, (batch, input_size), dtype=jnp.float32)
    # PyTorch nn.Linear stores (out, in); we initialize directly in (in, out)
    # layout so the math is equivalent.
    w1 = jax.random.normal(kw1, (input_size, hidden_size), dtype=jnp.float32) * 0.1
    b1 = jax.random.normal(kb1, (hidden_size,), dtype=jnp.float32) * 0.1
    w2 = jax.random.normal(kw2, (hidden_size, output_size), dtype=jnp.float32) * 0.1
    b2 = jax.random.normal(kb2, (output_size,), dtype=jnp.float32) * 0.1

    # Pad / stage the constant parameters ONCE (not per forward call).
    params = prepare_tanh_mlp_params(w1, b1, w2, b2)

    out = jax.block_until_ready(tanh_mlp_apply(params, x))
    ref = reference_tanh_mlp(x, w1, b1, w2, b2)
    assert out.shape == (batch, output_size)
    assert jnp.allclose(out, ref, atol=1e-5, rtol=1e-5)

    # Ragged batch with a forced multi-tile grid: exercises the no-batch-pad
    # boundary masking, resident weights, and the parallel batch axis.
    batch2 = 200
    x2 = jax.random.normal(jax.random.PRNGKey(1), (batch2, input_size),
                           dtype=jnp.float32)
    out2 = jax.block_until_ready(tanh_mlp_apply(params, x2, block_rows=64))
    ref2 = reference_tanh_mlp(x2, w1, b1, w2, b2)
    assert out2.shape == (batch2, output_size)
    assert jnp.allclose(out2, ref2, atol=1e-5, rtol=1e-5)

    # bf16 path: halves x/W1/W2 DMA bytes and uses the bf16 MXU peak; f32
    # accumulation keeps the error small (looser tolerance vs f32 reference).
    params_bf16 = prepare_tanh_mlp_params(w1, b1, w2, b2, use_bf16=True)
    out3 = jax.block_until_ready(tanh_mlp_apply(params_bf16, x2))
    assert out3.shape == (batch2, output_size)
    assert jnp.allclose(out3, ref2, atol=5e-2, rtol=5e-2)

    print("KERNEL_OK")
</pallas_src>

<mosaic_0001>
module attributes {stable_mosaic.version = 11 : i64} {
  func.func @tanh_mlp_kernel(%arg0: i32, %arg1: memref<8x32xf32, #tpu.memory_space<vmem>>, %arg2: memref<32x128xf32, #tpu.memory_space<vmem>>, %arg3: memref<1x128xf32, #tpu.memory_space<vmem>>, %arg4: memref<128x128xf32, #tpu.memory_space<vmem>>, %arg5: memref<1x128xf32, #tpu.memory_space<vmem>>, %arg6: memref<8x128xf32, #tpu.memory_space<vmem>>) attributes {dimension_semantics = [#tpu.dimension_semantics<parallel>], iteration_bounds = array<i64: 1>, scalar_prefetch = 0 : i64, scratch_operands = 0 : i64, tpu.core_type = #tpu.core_type<tc>, window_params = [{transform_indices = @transform_0, window_bounds = array<i64: 8, 32>}, {pipeline_mode = #tpu.pipeline_mode<synchronous>, transform_indices = @transform_1, window_bounds = array<i64: 32, 128>}, {pipeline_mode = #tpu.pipeline_mode<synchronous>, transform_indices = @transform_2, window_bounds = array<i64: 1, 128>}, {pipeline_mode = #tpu.pipeline_mode<synchronous>, transform_indices = @transform_3, window_bounds = array<i64: 128, 128>}, {pipeline_mode = #tpu.pipeline_mode<synchronous>, transform_indices = @transform_4, window_bounds = array<i64: 1, 128>}, {transform_indices = @transform_5, window_bounds = array<i64: 8, 128>}]} {
    %c0 = arith.constant 0 : index
    %c0_0 = arith.constant 0 : index
    %0 = vector.load %arg1[%c0, %c0_0] : memref<8x32xf32, #tpu.memory_space<vmem>>, vector<8x32xf32>
    %c0_1 = arith.constant 0 : index
    %c0_2 = arith.constant 0 : index
    %1 = vector.load %arg2[%c0_1, %c0_2] : memref<32x128xf32, #tpu.memory_space<vmem>>, vector<32x128xf32>
    %cst = arith.constant dense<0.000000e+00> : vector<8x128xf32>
    %2 = tpu.matmul %0, %1, %cst {dimension_numbers = #tpu.dot_dimension_numbers<[1], [0], [0], [1], [0, 0, 1, 1], [], []>} : vector<8x32xf32>, vector<32x128xf32>, vector<8x128xf32> -> vector<8x128xf32>
    %c0_3 = arith.constant 0 : index
    %c0_4 = arith.constant 0 : index
    %3 = vector.load %arg3[%c0_3, %c0_4] : memref<1x128xf32, #tpu.memory_space<vmem>>, vector<1x128xf32>
    %4 = vector.broadcast %3 : vector<1x128xf32> to vector<8x128xf32>
    %5 = arith.addf %2, %4 : vector<8x128xf32>
    %cst_5 = arith.constant 0.000000e+00 : f32
    %6 = vector.broadcast %cst_5 : f32 to vector<8x128xf32>
    %7 = arith.maximumf %5, %6 : vector<8x128xf32>
    %c0_6 = arith.constant 0 : index
    %c0_7 = arith.constant 0 : index
    %8 = vector.load %arg4[%c0_6, %c0_7] : memref<128x128xf32, #tpu.memory_space<vmem>>, vector<128x128xf32>
    %cst_8 = arith.constant dense<0.000000e+00> : vector<8x128xf32>
    %9 = tpu.matmul %7, %8, %cst_8 {dimension_numbers = #tpu.dot_dimension_numbers<[1], [0], [0], [1], [0, 0, 1, 1], [], []>} : vector<8x128xf32>, vector<128x128xf32>, vector<8x128xf32> -> vector<8x128xf32>
    %c0_9 = arith.constant 0 : index
    %c0_10 = arith.constant 0 : index
    %10 = vector.load %arg5[%c0_9, %c0_10] : memref<1x128xf32, #tpu.memory_space<vmem>>, vector<1x128xf32>
    %11 = vector.broadcast %10 : vector<1x128xf32> to vector<8x128xf32>
    %12 = arith.addf %9, %11 : vector<8x128xf32>
    %13 = math.tanh %12 : vector<8x128xf32>
    %c0_11 = arith.constant 0 : index
    %c0_12 = arith.constant 0 : index
    %14 = vector.load %arg6[%c0_11, %c0_12] : memref<8x128xf32, #tpu.memory_space<vmem>>, vector<8x128xf32>
    tpu.vector_store %arg6[%c0_11, %c0_12], %13 {strides = array<i32>} : memref<8x128xf32, #tpu.memory_space<vmem>>, vector<8x128xf32>,
    return
  }
  func.func @transform_0(%arg0: i32) -> (i32, i32) {
    %c0_i32 = arith.constant 0 : i32
    %c0_i32_0 = arith.constant 0 : i32
    return %arg0, %c0_i32 : i32, i32
  }
  func.func @transform_1(%arg0: i32) -> (i32, i32) {
    %c0_i32 = arith.constant 0 : i32
    %c0_i32_0 = arith.constant 0 : i32
    %c0_i32_1 = arith.constant 0 : i32
    return %c0_i32, %c0_i32_0 : i32, i32
  }
  func.func @transform_2(%arg0: i32) -> (i32, i32) {
    %c0_i32 = arith.constant 0 : i32
    %c0_i32_0 = arith.constant 0 : i32
    %c0_i32_1 = arith.constant 0 : i32
    return %c0_i32, %c0_i32_0 : i32, i32
  }
  func.func @transform_3(%arg0: i32) -> (i32, i32) {
    %c0_i32 = arith.constant 0 : i32
    %c0_i32_0 = arith.constant 0 : i32
    %c0_i32_1 = arith.constant 0 : i32
    return %c0_i32, %c0_i32_0 : i32, i32
  }
  func.func @transform_4(%arg0: i32) -> (i32, i32) {
    %c0_i32 = arith.constant 0 : i32
    %c0_i32_0 = arith.constant 0 : i32
    %c0_i32_1 = arith.constant 0 : i32
    return %c0_i32, %c0_i32_0 : i32, i32
  }
  func.func @transform_5(%arg0: i32) -> (i32, i32) {
    %c0_i32 = arith.constant 0 : i32
    %c0_i32_0 = arith.constant 0 : i32
    return %arg0, %c0_i32 : i32, i32
  }
}

module attributes {stable_mosaic.version = 11 : i64} {
  func.func @tanh_mlp_kernel(%arg0: i32, %arg1: memref<8x32xf32, #tpu.memory_space<vmem>>, %arg2: memref<32x128xf32, #tpu.memory_space<vmem>>, %arg3: memref<1x128xf32, #tpu.memory_space<vmem>>, %arg4: memref<128x128xf32, #tpu.memory_space<vmem>>, %arg5: memref<1x128xf32, #tpu.memory_space<vmem>>, %arg6: memref<8x128xf32, #tpu.memory_space<vmem>>) attributes {dimension_semantics = [#tpu.dimension_semantics<parallel>], iteration_bounds = array<i64: 1>, scalar_prefetch = 0 : i64, scratch_operands = 0 : i64, tpu.core_type = #tpu.core_type<tc>, window_params = [{transform_indices = @transform_0, window_bounds = array<i64: 8, 32>}, {pipeline_mode = #tpu.pipeline_mode<synchronous>, transform_indices = @transform_1, window_bounds = array<i64: 32, 128>}, {pipeline_mode = #tpu.pipeline_mode<synchronous>, transform_indices = @transform_2, window_bounds = array<i64: 1, 128>}, {pipeline_mode = #tpu.pipeline_mode<synchronous>, transform_indices = @transform_3, window_bounds = array<i64: 128, 128>}, {pipeline_mode = #tpu.pipeline_mode<synchronous>, transform_indices = @transform_4, window_bounds = array<i64: 1, 128>}, {transform_indices = @transform_5, window_bounds = array<i64: 8, 128>}]} {
    %c0 = arith.constant 0 : index
    %c0_0 = arith.constant 0 : index
    %0 = vector.load %arg1[%c0, %c0_0] : memref<8x32xf32, #tpu.memory_space<vmem>>, vector<8x32xf32>
    %c0_1 = arith.constant 0 : index
    %c0_2 = arith.constant 0 : index
    %1 = vector.load %arg2[%c0_1, %c0_2] : memref<32x128xf32, #tpu.memory_space<vmem>>, vector<32x128xf32>
    %cst = arith.constant dense<0.000000e+00> : vector<8x128xf32>
    %2 = tpu.matmul %0, %1, %cst {dimension_numbers = #tpu.dot_dimension_numbers<[1], [0], [0], [1], [0, 0, 1, 1], [], []>} : vector<8x32xf32>, vector<32x128xf32>, vector<8x128xf32> -> vector<8x128xf32>
    %c0_3 = arith.constant 0 : index
    %c0_4 = arith.constant 0 : index
    %3 = vector.load %arg3[%c0_3, %c0_4] : memref<1x128xf32, #tpu.memory_space<vmem>>, vector<1x128xf32>
    %4 = vector.broadcast %3 : vector<1x128xf32> to vector<8x128xf32>
    %5 = arith.addf %2, %4 : vector<8x128xf32>
    %cst_5 = arith.constant 0.000000e+00 : f32
    %6 = vector.broadcast %cst_5 : f32 to vector<8x128xf32>
    %7 = arith.maximumf %5, %6 : vector<8x128xf32>
    %c0_6 = arith.constant 0 : index
    %c0_7 = arith.constant 0 : index
    %8 = vector.load %arg4[%c0_6, %c0_7] : memref<128x128xf32, #tpu.memory_space<vmem>>, vector<128x128xf32>
    %cst_8 = arith.constant dense<0.000000e+00> : vector<8x128xf32>
    %9 = tpu.matmul %7, %8, %cst_8 {dimension_numbers = #tpu.dot_dimension_numbers<[1], [0], [0], [1], [0, 0, 1, 1], [], []>} : vector<8x128xf32>, vector<128x128xf32>, vector<8x128xf32> -> vector<8x128xf32>
    %c0_9 = arith.constant 0 : index
    %c0_10 = arith.constant 0 : index
    %10 = vector.load %arg5[%c0_9, %c0_10] : memref<1x128xf32, #tpu.memory_space<vmem>>, vector<1x128xf32>
    %11 = vector.broadcast %10 : vector<1x128xf32> to vector<8x128xf32>
    %12 = arith.addf %9, %11 : vector<8x128xf32>
    %13 = math.tanh %12 : vector<8x128xf32>
    %c0_11 = arith.constant 0 : index
    %c0_12 = arith.constant 0 : index
    %14 = vector.load %arg6[%c0_11, %c0_12] : memref<8x128xf32, #tpu.memory_space<vmem>>, vector<8x128xf32>
    tpu.vector_store %arg6[%c0_11, %c0_12], %13 {strides = array<i32>} : memref<8x128xf32, #tpu.memory_space<vmem>>, vector<8x128xf32>,
    return
  }
  func.func @transform_0(%arg0: i32) -> (i32, i32) {
    %c0_i32 = arith.constant 0 : i32
    %c0_i32_0 = arith.constant 0 : i32
    return %arg0, %c0_i32 : i32, i32
  }
  func.func @transform_1(%arg0: i32) -> (i32, i32) {
    %c0_i32 = arith.constant 0 : i32
    %c0_i32_0 = arith.constant 0 : i32
    %c0_i32_1 = arith.constant 0 : i32
    return %c0_i32, %c0_i32_0 : i32, i32
  }
  func.func @transform_2(%arg0: i32) -> (i32, i32) {
    %c0_i32 = arith.constant 0 : i32
    %c0_i32_0 = arith.constant 0 : i32
    %c0_i32_1 = arith.constant 0 : i32
    return %c0_i32, %c0_i32_0 : i32, i32
  }
  func.func @transform_3(%arg0: i32) -> (i32, i32) {
    %c0_i32 = arith.constant 0 : i32
    %c0_i32_0 = arith.constant 0 : i32
    %c0_i32_1 = arith.constant 0 : i32
    return %c0_i32, %c0_i32_0 : i32, i32
  }
  func.func @transform_4(%arg0: i32) -> (i32, i32) {
    %c0_i32 = arith.constant 0 : i32
    %c0_i32_0 = arith.constant 0 : i32
    %c0_i32_1 = arith.constant 0 : i32
    return %c0_i32, %c0_i32_0 : i32, i32
  }
  func.func @transform_5(%arg0: i32) -> (i32, i32) {
    %c0_i32 = arith.constant 0 : i32
    %c0_i32_0 = arith.constant 0 : i32
    return %arg0, %c0_i32 : i32, i32
  }
}

</mosaic_0001>

<bundles_post_ra>
// kernel: tpu_custom_call.1
= control target key start
LH: loop header
LB: loop body
LE: loop exit
PB: predicated region body
PF: predicated region fallthrough
CT: control target
= control target key end

     0   :  { %10 = vsyncpa [#allocation3], 0  ;;  %s503_s0 = inlined_call_operand.hbm [shape: f32[8,32], index: 0, kind: input, shape index: {}]   ;;  %s504_s1 = inlined_call_operand.hbm [shape: f32[32,128], index: 1, kind: input, shape index: {}]   ;;  %s505_s2 = inlined_call_operand.vmem [shape: f32[1,128], index: 2, kind: input, shape index: {}]   ;;  %s506_s3 = inlined_call_operand.hbm [shape: f32[128,128], index: 3, kind: input, shape index: {}]   ;;  %s507_s4 = inlined_call_operand.vmem [shape: f32[1,128], index: 4, kind: input, shape index: {}]   ;;  %s508_s5 = inlined_call_operand.hbm [shape: f32[8,128], index: 5, kind: output, shape index: {}]  }
   0x1   :  { %11 = vsyncpa [#allocation6], 0 }
   0x2   :  { %12 = vsyncpa [#allocation4], 0  ;;  %s425_s18 = smov [#allocation5]  }
   0x3   :  { %s28_s19 = sshll.u32 %s425_s18, 4  ;;  %s29_s19 = int_to_ptr.vmem [resolvable:$true] %s28_s19 }
   0x4   :  { %s347_s20 = scalar_lea.vmem %s29_s19, 512  ;;  %p352_p1 = scmp.lt.s32.totalorder %s29_s19, %s29_s19 }
   0x5   :  { %p348_p0 = scmp.ne.s32.totalorder %s29_s19, %s347_s20  ;;  %p353_p2 = scmp.lt.s32.totalorder %s347_s20, %s347_s20 }
   0x7   :  { %p354_p3 = por %p353_p2, %p352_p1 }
   0x9   :  { %p355_p4 = pnand %p354_p3, %p348_p0 }
   0xb   :  { %358 = shalt.err (!%p355_p4)
}
   0xc   :  { %s426_s21 = smov 128   ;;  %s427_s22 = smov 8  }
   0xd   :  { %34 = dma.hbm_to_vmem [thread:$0]  %s504_s1, 512, %s29_s19, [#allocation6], %s426_s21, %s426_s21, %s427_s22  }
   0xe   :  { %s428_s25 = smov [#allocation2]   ;;  %s429_s27 = smov [#allocation7]  }
   0xf   :  { %s19_s26 = sshll.u32 %s428_s25, 4  ;;  %s42_s28 = sshll.u32 %s429_s27, 4  ;;  %s20_s26 = int_to_ptr.vmem [resolvable:$true] %s19_s26  ;;  %s43_s28 = int_to_ptr.vmem [resolvable:$true] %s42_s28 }
  0x10   :  { %s367_s29 = scalar_lea.vmem %s20_s26, 128  ;;  %p372_p6 = scmp.lt.s32.totalorder %s20_s26, %s20_s26 }
  0x11   :  { %p368_p5 = scmp.ne.s32.totalorder %s20_s26, %s367_s29  ;;  %p373_p7 = scmp.lt.s32.totalorder %s367_s29, %s367_s29 }
  0x13   :  { %p374_p8 = por %p373_p7, %p372_p6 }
  0x15   :  { %p375_p9 = pnand %p374_p8, %p368_p5 }
  0x17   :  { %378 = shalt.err (!%p375_p9)
}
  0x18   :  { %22 = dma.hbm_to_vmem [thread:$0]  %s503_s0, 128, %s20_s26, [#allocation3]  }
  0x19   :  { %s387_s7 = scalar_lea.vmem %s43_s28, 2048  ;;  %p392_p11 = scmp.lt.s32.totalorder %s43_s28, %s43_s28 }
  0x1a   :  { %p388_p10 = scmp.ne.s32.totalorder %s43_s28, %s387_s7  ;;  %p393_p12 = scmp.lt.s32.totalorder %s387_s7, %s387_s7 }
  0x1c   :  { %p394_p13 = por %p393_p12, %p392_p11 }
  0x1e   :  { %p395_p0 = pnand %p394_p13, %p388_p10 }
  0x20   :  { %398 = shalt.err (!%p395_p0)
}
  0x21   :  { %48 = dma.hbm_to_vmem [thread:$0]  %s506_s3, 2048, %s43_s28, [#allocation6], %s426_s21, %s426_s21, %s427_s22  }
  0x22   :  { %419 = dma.done.wait [#allocation3], 128  }
  0x23   :  { %420 = vsyncadd [#allocation3], 4294967168 }
  0x24   :  { %421 = dma.done.wait [#allocation6], 2560  }
  0x25   :  { %422 = vsyncadd [#allocation6], 4294964736  ;;  %v430_v0 = vmov 0.0   ;;  %vm431_vm0 = vmmov 0   ;;  %v64_v1 = vld [vmem:[#allocation5 + $0x18] sm:$0xff]  ;;  %v63_v2 = vld [vmem:[#allocation5 + $0x10] sm:$0xff] }
  0x26   :  { %283 = vmatprep.subr.mxu0 %v430_v0  ;;  %291 = vmatprep.mubr.msk.f32.mxu0 %vm431_vm0, %v430_v0  ;;  %v162_v3 = vld [vmem:[#allocation7 + $0x78] sm:$0xff]  ;;  %v62_v4 = vld [vmem:[#allocation5 + $0x8] sm:$0xff]  ;;  %v161_v5 = vld [vmem:[#allocation7 + $0x70] sm:$0xff]  ;;  %vm72_vm1 = vcmask 261120   ;;  %s432_s11 = smov [#allocation8]  }
  0x27   :  { %294 = vmatprep.subr.mxu1 %v430_v0  ;;  %326 = vmatprep.mubr.msk.f32.mxu1 %vm431_vm0, %v430_v0  ;;  %v160_v6 = vld [vmem:[#allocation7 + $0x68] sm:$0xff]  ;;  %v61_v7 = vld [vmem:[#allocation5] sm:$0xff]  ;;  %v60_v8 = vld [vmem:[#allocation2] sm:$0xff]  ;;  %s248_s12 = sshll.u32 %s432_s11, 4  ;;  %s249_s12 = int_to_ptr.vmem [resolvable:$true] %s248_s12 }
  0x28   :  { %284 = vmatpush3.msra.mxu0 %v64_v1  ;;  %295 = vmatpush3.msra.mxu1 %v162_v3  ;;  %v159_v9 = vld [vmem:[#allocation7 + $0x60] sm:$0xff]  ;;  %v158_v10 = vld [vmem:[#allocation7 + $0x58] sm:$0xff]  ;;  %v157_v11 = vld [vmem:[#allocation7 + $0x50] sm:$0xff]  ;;  %s399_s13 = scalar_lea.vmem %s249_s12, 128  ;;  %p404_p2 = scmp.lt.s32.totalorder %s249_s12, %s249_s12 }
  0x29   :  { %285 = vmatprep.subr.mxu0 %v430_v0  ;;  %296 = vmatprep.subr.mxu1 %v430_v0  ;;  %v156_v12 = vld [vmem:[#allocation7 + $0x48] sm:$0xff]  ;;  %v155_v13 = vld [vmem:[#allocation7 + $0x40] sm:$0xff]  ;;  %v154_v14 = vld [vmem:[#allocation7 + $0x38] sm:$0xff]  ;;  %p400_p1 = scmp.ne.s32.totalorder %s249_s12, %s399_s13  ;;  %p405_p3 = scmp.lt.s32.totalorder %s399_s13, %s399_s13 }
  0x2a   :  { %286 = vmatpush3.msra.mxu0 %v63_v2  ;;  %297 = vmatpush3.msra.mxu1 %v161_v5  ;;  %v153_v15 = vld [vmem:[#allocation7 + $0x30] sm:$0xff]  ;;  %v152_v16 = vld [vmem:[#allocation7 + $0x28] sm:$0xff]  ;;  %v151_v17 = vld [vmem:[#allocation7 + $0x20] sm:$0xff] }
  0x2b   :  { %287 = vmatprep.subr.mxu0 %v430_v0  ;;  %298 = vmatprep.subr.mxu1 %v430_v0  ;;  %v150_v18 = vld [vmem:[#allocation7 + $0x18] sm:$0xff]  ;;  %v149_v19 = vld [vmem:[#allocation7 + $0x10] sm:$0xff]  ;;  %v148_v20 = vld [vmem:[#allocation7 + $0x8] sm:$0xff]  ;;  %p406_p4 = por %p405_p3, %p404_p2 }
  0x2c   :  { %288 = vmatpush3.msra.mxu0 %v62_v4  ;;  %299 = vmatpush3.msra.mxu1 %v160_v6  ;;  %v147_v21 = vld [vmem:[#allocation7] sm:$0xff]  ;;  %v258_v22 = vld [vmem:[%s505_s2] ss:$0 sm:$0xff] }
  0x2d   :  { %289 = vmatprep.subr.mxu0 %v430_v0  ;;  %300 = vmatprep.subr.mxu1 %v430_v0  ;;  %v260_v27 = vld [vmem:[%s507_s4] ss:$0 sm:$0xff]  ;;  %p407_p5 = pnand %p406_p4, %p400_p1 }
  0x2e   :  { %290 = vmatpush3.msra.mxu0 %v61_v7  ;;  %301 = vmatpush3.msra.mxu1 %v159_v9 }
  0x2f   :  { %292 = vmatmul.mubr.msk.f32.vlgmr.msra.gmra.mxu0 %vm72_vm1, %v60_v8  ;;  %302 = vmatprep.subr.mxu1 %v430_v0 }
  0x30   :  { %303 = vmatpush3.msra.mxu1 %v158_v10 }
  0x31   :  { %304 = vmatprep.subr.mxu1 %v430_v0 }
  0x32   :  { %305 = vmatpush3.msra.mxu1 %v157_v11 }
  0x33   :  { %306 = vmatprep.subr.mxu1 %v430_v0 }
  0x34   :  { %307 = vmatpush3.msra.mxu1 %v156_v12 }
  0x35   :  { %308 = vmatprep.subr.mxu1 %v430_v0 }
  0x36   :  { %309 = vmatpush3.msra.mxu1 %v155_v13 }
  0x37   :  { %310 = vmatprep.subr.mxu1 %v430_v0 }
  0x38   :  { %311 = vmatpush3.msra.mxu1 %v154_v14 }
  0x39   :  { %312 = vmatprep.subr.mxu1 %v430_v0 }
  0x3a   :  { %313 = vmatpush3.msra.mxu1 %v153_v15 }
  0x3b   :  { %314 = vmatprep.subr.mxu1 %v430_v0 }
  0x3c   :  { %315 = vmatpush3.msra.mxu1 %v152_v16 }
  0x3d   :  { %316 = vmatprep.subr.mxu1 %v430_v0 }
  0x3e   :  { %317 = vmatpush3.msra.mxu1 %v151_v17 }
  0x3f   :  { %318 = vmatprep.subr.mxu1 %v430_v0 }
  0x40   :  { %319 = vmatpush3.msra.mxu1 %v150_v18 }
  0x41   :  { %320 = vmatprep.subr.mxu1 %v430_v0 }
  0x42   :  { %321 = vmatpush3.msra.mxu1 %v149_v19 }
  0x43   :  { %322 = vmatprep.subr.mxu1 %v430_v0 }
  0x44   :  { %323 = vmatpush3.msra.mxu1 %v148_v20 }
  0x45   :  { %324 = vmatprep.subr.mxu1 %v430_v0 }
  0x46   :  { %325 = vmatpush3.msra.mxu1 %v147_v21 }
  0xef   :  { %v142_v23 = vpop.f32.mrf.mxu0 }
  0xf0   :  { %v143_v24 = vadd.f32 %v258_v22, %v142_v23 }
  0xf1   :  { %v293_v25 = vpop.f32.mrf.mxu0 }
  0xf2   :  { %v146_v26 = vmax.f32 %v143_v24, 0.0 }
  0xf4   :  { %327 = vmatmul.mubr.f32.vlgmr.msra.gmra.mxu1 %v146_v26 }
 0x1b4   :  { %v236_v28 = vpop.f32.mrf.mxu1 }
 0x1b5   :  { %v237_v29 = vadd.f32 %v260_v27, %v236_v28 }
 0x1b6   :  { %v328_v30 = vpop.f32.mrf.mxu1 }
 0x1b7   :  { %337 = vtanh.f32 %v237_v29 }
 0x1c4   :  { %v338_v31 = vpop.eup %337 }
 0x1c5   :  { %241 = vst [vmem:[#allocation8] sm:$0xff] %v338_v31 }
 0x1c6   :  { %410 = shalt.err (!%p407_p5)
}
 0x1c7   :  { %251 = dma.vmem_to_hbm [thread:$0]  %s249_s12, 128, %s508_s5, [#allocation4]  }
 0x1c8   :  { %423 = dma.done.wait [#allocation4], 128  }
 0x1c9   :  { %424 = vsyncadd [#allocation4], 4294967168 }
 0x1ca   :  { %255 = vsyncpa [#allocation3], 1 }
 0x1cb   :  { %256 = vsyncpa [#allocation6], 1 }
 0x1cc   :  { %257 = vsyncpa [#allocation4], 1 }

// kernel: tpu_custom_call.1
= control target key start
LH: loop header
LB: loop body
LE: loop exit
PB: predicated region body
PF: predicated region fallthrough
CT: control target
= control target key end

     0   :  { %10 = vsyncpa [#allocation3], 0  ;;  %s503_s0 = inlined_call_operand.hbm [shape: f32[8,32], index: 0, kind: input, shape index: {}]   ;;  %s504_s1 = inlined_call_operand.hbm [shape: f32[32,128], index: 1, kind: input, shape index: {}]   ;;  %s505_s2 = inlined_call_operand.vmem [shape: f32[1,128], index: 2, kind: input, shape index: {}]   ;;  %s506_s3 = inlined_call_operand.hbm [shape: f32[128,128], index: 3, kind: input, shape index: {}]   ;;  %s507_s4 = inlined_call_operand.vmem [shape: f32[1,128], index: 4, kind: input, shape index: {}]   ;;  %s508_s5 = inlined_call_operand.hbm [shape: f32[8,128], index: 5, kind: output, shape index: {}]  }
   0x1   :  { %11 = vsyncpa [#allocation6], 0 }
   0x2   :  { %12 = vsyncpa [#allocation4], 0  ;;  %s425_s18 = smov [#allocation5]  }
   0x3   :  { %s28_s19 = sshll.u32 %s425_s18, 4  ;;  %s29_s19 = int_to_ptr.vmem [resolvable:$true] %s28_s19 }
   0x4   :  { %s347_s20 = scalar_lea.vmem %s29_s19, 512  ;;  %p352_p1 = scmp.lt.s32.totalorder %s29_s19, %s29_s19 }
   0x5   :  { %p348_p0 = scmp.ne.s32.totalorder %s29_s19, %s347_s20  ;;  %p353_p2 = scmp.lt.s32.totalorder %s347_s20, %s347_s20 }
   0x7   :  { %p354_p3 = por %p353_p2, %p352_p1 }
   0x9   :  { %p355_p4 = pnand %p354_p3, %p348_p0 }
   0xb   :  { %358 = shalt.err (!%p355_p4)
}
   0xc   :  { %s426_s21 = smov 128   ;;  %s427_s22 = smov 8  }
   0xd   :  { %34 = dma.hbm_to_vmem [thread:$0]  %s504_s1, 512, %s29_s19, [#allocation6], %s426_s21, %s426_s21, %s427_s22  }
   0xe   :  { %s428_s25 = smov [#allocation2]   ;;  %s429_s27 = smov [#allocation7]  }
   0xf   :  { %s19_s26 = sshll.u32 %s428_s25, 4  ;;  %s42_s28 = sshll.u32 %s429_s27, 4  ;;  %s20_s26 = int_to_ptr.vmem [resolvable:$true] %s19_s26  ;;  %s43_s28 = int_to_ptr.vmem [resolvable:$true] %s42_s28 }
  0x10   :  { %s367_s29 = scalar_lea.vmem %s20_s26, 128  ;;  %p372_p6 = scmp.lt.s32.totalorder %s20_s26, %s20_s26 }
  0x11   :  { %p368_p5 = scmp.ne.s32.totalorder %s20_s26, %s367_s29  ;;  %p373_p7 = scmp.lt.s32.totalorder %s367_s29, %s367_s29 }
  0x13   :  { %p374_p8 = por %p373_p7, %p372_p6 }
  0x15   :  { %p375_p9 = pnand %p374_p8, %p368_p5 }
  0x17   :  { %378 = shalt.err (!%p375_p9)
}
  0x18   :  { %22 = dma.hbm_to_vmem [thread:$0]  %s503_s0, 128, %s20_s26, [#allocation3]  }
  0x19   :  { %s387_s7 = scalar_lea.vmem %s43_s28, 2048  ;;  %p392_p11 = scmp.lt.s32.totalorder %s43_s28, %s43_s28 }
  0x1a   :  { %p388_p10 = scmp.ne.s32.totalorder %s43_s28, %s387_s7  ;;  %p393_p12 = scmp.lt.s32.totalorder %s387_s7, %s387_s7 }
  0x1c   :  { %p394_p13 = por %p393_p12, %p392_p11 }
  0x1e   :  { %p395_p0 = pnand %p394_p13, %p388_p10 }
  0x20   :  { %398 = shalt.err (!%p395_p0)
}
  0x21   :  { %48 = dma.hbm_to_vmem [thread:$0]  %s506_s3, 2048, %s43_s28, [#allocation6], %s426_s21, %s426_s21, %s427_s22  }
  0x22   :  { %419 = dma.done.wait [#allocation3], 128  }
  0x23   :  { %420 = vsyncadd [#allocation3], 4294967168 }
  0x24   :  { %421 = dma.done.wait [#allocation6], 2560  }
  0x25   :  { %422 = vsyncadd [#allocation6], 4294964736  ;;  %v430_v0 = vmov 0.0   ;;  %vm431_vm0 = vmmov 0   ;;  %v64_v1 = vld [vmem:[#allocation5 + $0x18] sm:$0xff]  ;;  %v63_v2 = vld [vmem:[#allocation5 + $0x10] sm:$0xff] }
  0x26   :  { %283 = vmatprep.subr.mxu0 %v430_v0  ;;  %291 = vmatprep.mubr.msk.f32.mxu0 %vm431_vm0, %v430_v0  ;;  %v162_v3 = vld [vmem:[#allocation7 + $0x78] sm:$0xff]  ;;  %v62_v4 = vld [vmem:[#allocation5 + $0x8] sm:$0xff]  ;;  %v161_v5 = vld [vmem:[#allocation7 + $0x70] sm:$0xff]  ;;  %vm72_vm1 = vcmask 261120   ;;  %s432_s11 = smov [#allocation8]  }
  0x27   :  { %294 = vmatprep.subr.mxu1 %v430_v0  ;;  %326 = vmatprep.mubr.msk.f32.mxu1 %vm431_vm0, %v430_v0  ;;  %v160_v6 = vld [vmem:[#allocation7 + $0x68] sm:$0xff]  ;;  %v61_v7 = vld [vmem:[#allocation5] sm:$0xff]  ;;  %v60_v8 = vld [vmem:[#allocation2] sm:$0xff]  ;;  %s248_s12 = sshll.u32 %s432_s11, 4  ;;  %s249_s12 = int_to_ptr.vmem [resolvable:$true] %s248_s12 }
  0x28   :  { %284 = vmatpush3.msra.mxu0 %v64_v1  ;;  %295 = vmatpush3.msra.mxu1 %v162_v3  ;;  %v159_v9 = vld [vmem:[#allocation7 + $0x60] sm:$0xff]  ;;  %v158_v10 = vld [vmem:[#allocation7 + $0x58] sm:$0xff]  ;;  %v157_v11 = vld [vmem:[#allocation7 + $0x50] sm:$0xff]  ;;  %s399_s13 = scalar_lea.vmem %s249_s12, 128  ;;  %p404_p2 = scmp.lt.s32.totalorder %s249_s12, %s249_s12 }
  0x29   :  { %285 = vmatprep.subr.mxu0 %v430_v0  ;;  %296 = vmatprep.subr.mxu1 %v430_v0  ;;  %v156_v12 = vld [vmem:[#allocation7 + $0x48] sm:$0xff]  ;;  %v155_v13 = vld [vmem:[#allocation7 + $0x40] sm:$0xff]  ;;  %v154_v14 = vld [vmem:[#allocation7 + $0x38] sm:$0xff]  ;;  %p400_p1 = scmp.ne.s32.totalorder %s249_s12, %s399_s13  ;;  %p405_p3 = scmp.lt.s32.totalorder %s399_s13, %s399_s13 }
  0x2a   :  { %286 = vmatpush3.msra.mxu0 %v63_v2  ;;  %297 = vmatpush3.msra.mxu1 %v161_v5  ;;  %v153_v15 = vld [vmem:[#allocation7 + $0x30] sm:$0xff]  ;;  %v152_v16 = vld [vmem:[#allocation7 + $0x28] sm:$0xff]  ;;  %v151_v17 = vld [vmem:[#allocation7 + $0x20] sm:$0xff] }
  0x2b   :  { %287 = vmatprep.subr.mxu0 %v430_v0  ;;  %298 = vmatprep.subr.mxu1 %v430_v0  ;;  %v150_v18 = vld [vmem:[#allocation7 + $0x18] sm:$0xff]  ;;  %v149_v19 = vld [vmem:[#allocation7 + $0x10] sm:$0xff]  ;;  %v148_v20 = vld [vmem:[#allocation7 + $0x8] sm:$0xff]  ;;  %p406_p4 = por %p405_p3, %p404_p2 }
  0x2c   :  { %288 = vmatpush3.msra.mxu0 %v62_v4  ;;  %299 = vmatpush3.msra.mxu1 %v160_v6  ;;  %v147_v21 = vld [vmem:[#allocation7] sm:$0xff]  ;;  %v258_v22 = vld [vmem:[%s505_s2] ss:$0 sm:$0xff] }
  0x2d   :  { %289 = vmatprep.subr.mxu0 %v430_v0  ;;  %300 = vmatprep.subr.mxu1 %v430_v0  ;;  %v260_v27 = vld [vmem:[%s507_s4] ss:$0 sm:$0xff]  ;;  %p407_p5 = pnand %p406_p4, %p400_p1 }
  0x2e   :  { %290 = vmatpush3.msra.mxu0 %v61_v7  ;;  %301 = vmatpush3.msra.mxu1 %v159_v9 }
  0x2f   :  { %292 = vmatmul.mubr.msk.f32.vlgmr.msra.gmra.mxu0 %vm72_vm1, %v60_v8  ;;  %302 = vmatprep.subr.mxu1 %v430_v0 }
  0x30   :  { %303 = vmatpush3.msra.mxu1 %v158_v10 }
  0x31   :  { %304 = vmatprep.subr.mxu1 %v430_v0 }
  0x32   :  { %305 = vmatpush3.msra.mxu1 %v157_v11 }
  0x33   :  { %306 = vmatprep.subr.mxu1 %v430_v0 }
  0x34   :  { %307 = vmatpush3.msra.mxu1 %v156_v12 }
  0x35   :  { %308 = vmatprep.subr.mxu1 %v430_v0 }
  0x36   :  { %309 = vmatpush3.msra.mxu1 %v155_v13 }
  0x37   :  { %310 = vmatprep.subr.mxu1 %v430_v0 }
  0x38   :  { %311 = vmatpush3.msra.mxu1 %v154_v14 }
  0x39   :  { %312 = vmatprep.subr.mxu1 %v430_v0 }
  0x3a   :  { %313 = vmatpush3.msra.mxu1 %v153_v15 }
  0x3b   :  { %314 = vmatprep.subr.mxu1 %v430_v0 }
  0x3c   :  { %315 = vmatpush3.msra.mxu1 %v152_v16 }
  0x3d   :  { %316 = vmatprep.subr.mxu1 %v430_v0 }
  0x3e   :  { %317 = vmatpush3.msra.mxu1 %v151_v17 }
  0x3f   :  { %318 = vmatprep.subr.mxu1 %v430_v0 }
  0x40   :  { %319 = vmatpush3.msra.mxu1 %v150_v18 }
  0x41   :  { %320 = vmatprep.subr.mxu1 %v430_v0 }
  0x42   :  { %321 = vmatpush3.msra.mxu1 %v149_v19 }
  0x43   :  { %322 = vmatprep.subr.mxu1 %v430_v0 }
  0x44   :  { %323 = vmatpush3.msra.mxu1 %v148_v20 }
  0x45   :  { %324 = vmatprep.subr.mxu1 %v430_v0 }
  0x46   :  { %325 = vmatpush3.msra.mxu1 %v147_v21 }
  0xef   :  { %v142_v23 = vpop.f32.mrf.mxu0 }
  0xf0   :  { %v143_v24 = vadd.f32 %v258_v22, %v142_v23 }
  0xf1   :  { %v293_v25 = vpop.f32.mrf.mxu0 }
  0xf2   :  { %v146_v26 = vmax.f32 %v143_v24, 0.0 }
  0xf4   :  { %327 = vmatmul.mubr.f32.vlgmr.msra.gmra.mxu1 %v146_v26 }
 0x1b4   :  { %v236_v28 = vpop.f32.mrf.mxu1 }
 0x1b5   :  { %v237_v29 = vadd.f32 %v260_v27, %v236_v28 }
 0x1b6   :  { %v328_v30 = vpop.f32.mrf.mxu1 }
 0x1b7   :  { %337 = vtanh.f32 %v237_v29 }
 0x1c4   :  { %v338_v31 = vpop.eup %337 }
 0x1c5   :  { %241 = vst [vmem:[#allocation8] sm:$0xff] %v338_v31 }
 0x1c6   :  { %410 = shalt.err (!%p407_p5)
}
 0x1c7   :  { %251 = dma.vmem_to_hbm [thread:$0]  %s249_s12, 128, %s508_s5, [#allocation4]  }
 0x1c8   :  { %423 = dma.done.wait [#allocation4], 128  }
 0x1c9   :  { %424 = vsyncadd [#allocation4], 4294967168 }
 0x1ca   :  { %255 = vsyncpa [#allocation3], 1 }
 0x1cb   :  { %256 = vsyncpa [#allocation6], 1 }
 0x1cc   :  { %257 = vsyncpa [#allocation4], 1 }

</bundles_post_ra>
